<compile_context>
chip_gen: v7x
topology: tpu7x:2x2x1
jax: 0.10.0
libtpu: 0.0.40
codegen_flags: <defaults>
</compile_context>

<pallas_src>
import functools

import jax
import jax.numpy as jnp
from jax.experimental import pallas as pl
from jax.experimental.pallas import tpu as pltpu


def _round_up(n, m):
    return -(-n // m) * m


def _flow_fwd_kernel(x_ref, w1_ref, b1_ref, w2_ref, b2_ref, sel_ref,
                     y_ref, logdet_ref):
    """One batch tile of the lane-packed flow forward.

    Shapes (pack = original rows packed per lane-dense row):
      x_ref      [bp, pack*D]
      w1_ref     [pack*D, pack*H]   block-diagonal copies of W1 (resident)
      b1_ref     [1, pack*H]
      w2_ref     [pack*H, pack*D]   block-diagonal copies of W2 (resident)
      b2_ref     [1, pack*D]
      sel_ref    [pack*D, pack]     0/1 segment-sum selector
      y_ref      [bp, pack*D]
      logdet_ref [bp, pack]
    """
    x = x_ref[...]

    # fc[0]: Linear(D, H) + ReLU   (MXU, f32 accumulation)
    h1 = jnp.dot(x, w1_ref[...], preferred_element_type=jnp.float32)
    h1 = jnp.maximum(h1 + b1_ref[...].astype(jnp.float32), 0.0)

    # fc[2]: Linear(H, D)
    h = jnp.dot(h1.astype(w2_ref.dtype), w2_ref[...],
                preferred_element_type=jnp.float32)
    h = h + b2_ref[...].astype(jnp.float32)

    # Flow transform: lane-dense f32 epilogue; tanh/exp ride the EUP slot.
    scale = jnp.tanh(h)
    y = x.astype(jnp.float32) * jnp.exp(scale) + h
    y_ref[...] = y.astype(y_ref.dtype)

    # Per-original-row logdet = segment sum of `scale` over its D-wide lane
    # segment, done as a tiny selector matmul instead of a sublane<->lane
    # relayout.  `scale` is split hi+lo (hi is bf16-exact) so the sum keeps
    # ~f32 accuracy even if the MXU contracts f32 operands at bf16 (the TPU
    # default matmul precision); the two [bp, pack*D]x[pack*D, pack] pushes
    # are noise next to the main matmuls.
    s_hi = scale.astype(jnp.bfloat16).astype(jnp.float32)
    s_lo = scale - s_hi
    ld = jnp.dot(s_hi, sel_ref[...], preferred_element_type=jnp.float32)
    ld = ld + jnp.dot(s_lo, sel_ref[...], preferred_element_type=jnp.float32)
    logdet_ref[...] = ld.astype(logdet_ref.dtype)


def _block_diag(w, pack):
    """[A, B] -> [pack*A, pack*B] with `pack` copies of `w` on the diagonal."""
    a, b = w.shape
    eye = jnp.eye(pack, dtype=w.dtype)
    return (eye[:, None, :, None] * w[None, :, None, :]).reshape(pack * a, pack * b)


def autoregressive_flow_forward(x, w1, b1, w2, b2, *, pack=8, block_rows=8192):
    """Forward pass of AutoregressiveFlow: h = fc(x); y = x*exp(tanh(h)) + h.

    x:  [B, D]
    w1: [D, H], b1: [H]   (transposed vs. torch Linear.weight)
    w2: [H, D], b2: [D]
    pack:       batch rows lane-packed per MXU row. 8 -> K = 8*D = 128 lanes
                (exact fit for v5e's 128-wide MXU); 16 -> K = 256 (exact fit
                for v6e/v7x).  Sweepable.
    block_rows: target original rows per grid step (~block_rows*D*4 bytes of x
                per tile; default 8192 rows ~= 512 KB at D=16).  Sweepable.
    Returns (y [B, D], logdet [B] float32).
    """
    B, D = x.shape
    H = w1.shape[1]
    Kp, Hp = pack * D, pack * H

    # ---- lane-pack the batch ------------------------------------------------
    # `pack` consecutive rows of x become one lane-dense row of width pack*D;
    # the reshape is a free row-major view.  Only ragged batches (B % pack != 0
    # or fewer than one sublane-aligned packed tile) pay a small pad + slice;
    # aligned batches -- the perf path -- emit no pad/slice at all.
    b_ceil = pack * 8 if B < pack * 8 else _round_up(B, pack)
    x_in = x if b_ceil == B else jnp.pad(x, ((0, b_ceil - B), (0, 0)))
    bp_total = b_ceil // pack
    x_packed = x_in.reshape(bp_total, Kp)

    # ---- packed parameters (tiny; built by XLA around the kernel) -----------
    w1_blk = _block_diag(w1, pack)                                  # [Kp, Hp]
    w2_blk = _block_diag(w2, pack)                                  # [Hp, Kp]
    b1_pk = jnp.tile(b1, pack).reshape(1, Hp)
    b2_pk = jnp.tile(b2, pack).reshape(1, Kp)
    sel = jnp.repeat(jnp.eye(pack, dtype=jnp.float32), D, axis=0)   # [Kp, pack]

    # ---- batch tiling --------------------------------------------------------
    # Big tiles amortize the ~0.35us/step pipeline overhead; keep the tile a
    # multiple of 8 packed rows (sublane) and keep >=2 grid steps when there is
    # enough work so "parallel" can shard tiles across v7x's two TensorCores.
    target_bp = max(8, _round_up(max(block_rows // pack, 1), 8))
    block_bp = max(8, min(target_bp, (bp_total // 8) * 8))
    if bp_total >= 16 and pl.cdiv(bp_total, block_bp) < 2:
        block_bp = max(8, _round_up(pl.cdiv(bp_total, 2), 8))
    num_blocks = pl.cdiv(bp_total, block_bp)
    # Any final partial tile relies on Pallas' bounds-checked block copies:
    # all ops are row-local, so the out-of-bounds rows are never consumed.

    rows = num_blocks * block_bp
    itemsize = jnp.dtype(x.dtype).itemsize
    w_itemsize = jnp.dtype(w1.dtype).itemsize
    cost = pl.CostEstimate(
        flops=4 * rows * Kp * Hp + 4 * rows * Kp * pack + 6 * rows * Kp,
        transcendentals=2 * rows * Kp,
        bytes_accessed=(2 * rows * Kp * itemsize
                        + (2 * Kp * Hp + Hp + Kp) * w_itemsize
                        + Kp * pack * 4 + rows * pack * 4),
    )

    y_packed, logdet_packed = pl.pallas_call(
        _flow_fwd_kernel,
        out_shape=(
            jax.ShapeDtypeStruct((bp_total, Kp), x.dtype),
            jax.ShapeDtypeStruct((bp_total, pack), jnp.float32),
        ),
        grid_spec=pltpu.PrefetchScalarGridSpec(
            num_scalar_prefetch=0,
            grid=(num_blocks,),
            in_specs=[
                pl.BlockSpec((block_bp, Kp), lambda i: (i, 0)),    # x tile
                pl.BlockSpec((Kp, Hp), lambda i: (0, 0)),          # W1 (resident)
                pl.BlockSpec((1, Hp), lambda i: (0, 0)),           # b1
                pl.BlockSpec((Hp, Kp), lambda i: (0, 0)),          # W2 (resident)
                pl.BlockSpec((1, Kp), lambda i: (0, 0)),           # b2
                pl.BlockSpec((Kp, pack), lambda i: (0, 0)),        # selector
            ],
            out_specs=[
                pl.BlockSpec((block_bp, Kp), lambda i: (i, 0)),    # y tile
                pl.BlockSpec((block_bp, pack), lambda i: (i, 0)),  # logdet tile
            ],
        ),
        compiler_params=pltpu.CompilerParams(
            dimension_semantics=("parallel",),   # batch tiles across TCs (v7x)
        ),
        cost_estimate=cost,
    )(x_packed, w1_blk, b1_pk, w2_blk, b2_pk, sel)

    # Free row-major views back to per-row layout.
    y = y_packed.reshape(b_ceil, D)
    logdet = logdet_packed.reshape(b_ceil)
    if b_ceil != B:
        y, logdet = y[:B], logdet[:B]
    return y, logdet


def _reference_forward(x, w1, b1, w2, b2):
    h1 = jnp.maximum(x @ w1 + b1, 0.0)
    h = h1 @ w2 + b2
    scale = jnp.tanh(h)
    return x * jnp.exp(scale) + h, scale.sum(axis=-1)


def _bf16_exact(a):
    # Demo data with bf16-exactly-representable values: any bf16 rounding done
    # by a matmul contraction is then a no-op on the operands, so kernel vs.
    # XLA-reference agreement does not depend on the first matmul's
    # contraction strategy.
    return a.astype(jnp.bfloat16).astype(jnp.float32)


def _check(out, ref, *, atol):
    assert out.shape == ref.shape, (out.shape, ref.shape)
    err = float(jnp.max(jnp.abs(out.astype(jnp.float32) - ref)))
    assert bool(jnp.allclose(out, ref, atol=atol, rtol=2e-2)), f"max abs err {err}"


if __name__ == "__main__":
    # Shapes consistent with the module: input_dim=16, hidden_dim=32.
    D, H = 16, 32

    key = jax.random.PRNGKey(0)
    kx, k1, k2, k3, k4, kx2 = jax.random.split(key, 6)

    w1 = _bf16_exact(jax.random.normal(k1, (D, H), jnp.float32) / jnp.sqrt(D))
    b1 = _bf16_exact(jax.random.normal(k2, (H,), jnp.float32) * 0.01)
    w2 = _bf16_exact(jax.random.normal(k3, (H, D), jnp.float32) / jnp.sqrt(H))
    b2 = _bf16_exact(jax.random.normal(k4, (D,), jnp.float32) * 0.01)

    # Tolerances: with matched f32 contraction strategies the kernel and the
    # jnp reference agree to ~1e-5; the looser bounds below only cover the
    # case where the Mosaic MXU and the XLA reference pick different default
    # f32 matmul contraction precisions (bf16 vs. f32) on the second matmul.
    Y_ATOL, LD_ATOL = 2e-2, 3e-2

    # Case 1: aligned batch, pack=8 (K=128, fits every MXU) -> no pad/slice,
    # two parallel grid steps (v7x megacore split).
    B = 512
    x = _bf16_exact(jax.random.normal(kx, (B, D), jnp.float32))
    fwd8 = jax.jit(functools.partial(autoregressive_flow_forward, pack=8))
    y, logdet = fwd8(x, w1, b1, w2, b2)
    jax.block_until_ready((y, logdet))
    y_ref, ld_ref = _reference_forward(x, w1, b1, w2, b2)
    assert y.shape == (B, D) and logdet.shape == (B,)
    _check(y, y_ref, atol=Y_ATOL)
    _check(logdet, ld_ref, atol=LD_ATOL)

    # Case 2: pack=16 (K=256, exact fit for v6e/v7x 256-wide MXU).
    fwd16 = jax.jit(functools.partial(autoregressive_flow_forward, pack=16))
    y16, logdet16 = fwd16(x, w1, b1, w2, b2)
    jax.block_until_ready((y16, logdet16))
    _check(y16, y_ref, atol=Y_ATOL)
    _check(logdet16, ld_ref, atol=LD_ATOL)

    # Case 3: small ragged batch exercises the (tiny) pad + partial-tile path.
    B2 = 10
    x2 = _bf16_exact(jax.random.normal(kx2, (B2, D), jnp.float32))
    y2, logdet2 = fwd8(x2, w1, b1, w2, b2)
    jax.block_until_ready((y2, logdet2))
    y2_ref, ld2_ref = _reference_forward(x2, w1, b1, w2, b2)
    assert y2.shape == (B2, D) and logdet2.shape == (B2,)
    _check(y2, y2_ref, atol=Y_ATOL)
    _check(logdet2, ld2_ref, atol=LD_ATOL)

    print("KERNEL_OK")
</pallas_src>

<mosaic_0001>
module attributes {stable_mosaic.version = 11 : i64} {
  func.func @_flow_fwd_kernel(%arg0: i32, %arg1: memref<32x128xf32, #tpu.memory_space<vmem>>, %arg2: memref<128x256xf32, #tpu.memory_space<vmem>>, %arg3: memref<1x256xf32, #tpu.memory_space<vmem>>, %arg4: memref<256x128xf32, #tpu.memory_space<vmem>>, %arg5: memref<1x128xf32, #tpu.memory_space<vmem>>, %arg6: memref<128x8xf32, #tpu.memory_space<vmem>>, %arg7: memref<32x128xf32, #tpu.memory_space<vmem>>, %arg8: memref<32x8xf32, #tpu.memory_space<vmem>>) attributes {dimension_semantics = [#tpu.dimension_semantics<parallel>], iteration_bounds = array<i64: 2>, scalar_prefetch = 0 : i64, scratch_operands = 0 : i64, tpu.core_type = #tpu.core_type<tc>, window_params = [{transform_indices = @transform_0, window_bounds = array<i64: 32, 128>}, {pipeline_mode = #tpu.pipeline_mode<synchronous>, transform_indices = @transform_1, window_bounds = array<i64: 128, 256>}, {pipeline_mode = #tpu.pipeline_mode<synchronous>, transform_indices = @transform_2, window_bounds = array<i64: 1, 256>}, {pipeline_mode = #tpu.pipeline_mode<synchronous>, transform_indices = @transform_3, window_bounds = array<i64: 256, 128>}, {pipeline_mode = #tpu.pipeline_mode<synchronous>, transform_indices = @transform_4, window_bounds = array<i64: 1, 128>}, {pipeline_mode = #tpu.pipeline_mode<synchronous>, transform_indices = @transform_5, window_bounds = array<i64: 128, 8>}, {transform_indices = @transform_6, window_bounds = array<i64: 32, 128>}, {transform_indices = @transform_7, window_bounds = array<i64: 32, 8>}]} {
    %c0 = arith.constant 0 : index
    %c0_0 = arith.constant 0 : index
    %0 = vector.load %arg1[%c0, %c0_0] : memref<32x128xf32, #tpu.memory_space<vmem>>, vector<32x128xf32>
    %c0_1 = arith.constant 0 : index
    %c0_2 = arith.constant 0 : index
    %1 = vector.load %arg2[%c0_1, %c0_2] : memref<128x256xf32, #tpu.memory_space<vmem>>, vector<128x256xf32>
    %cst = arith.constant dense<0.000000e+00> : vector<32x256xf32>
    %2 = tpu.matmul %0, %1, %cst {dimension_numbers = #tpu.dot_dimension_numbers<[1], [0], [0], [1], [0, 0, 1, 1], [], []>} : vector<32x128xf32>, vector<128x256xf32>, vector<32x256xf32> -> vector<32x256xf32>
    %c0_3 = arith.constant 0 : index
    %c0_4 = arith.constant 0 : index
    %3 = vector.load %arg3[%c0_3, %c0_4] : memref<1x256xf32, #tpu.memory_space<vmem>>, vector<1x256xf32>
    %4 = vector.broadcast %3 : vector<1x256xf32> to vector<32x256xf32>
    %5 = arith.addf %2, %4 : vector<32x256xf32>
    %cst_5 = arith.constant 0.000000e+00 : f32
    %6 = vector.broadcast %cst_5 : f32 to vector<32x256xf32>
    %7 = arith.maximumf %5, %6 : vector<32x256xf32>
    %c0_6 = arith.constant 0 : index
    %c0_7 = arith.constant 0 : index
    %8 = vector.load %arg4[%c0_6, %c0_7] : memref<256x128xf32, #tpu.memory_space<vmem>>, vector<256x128xf32>
    %cst_8 = arith.constant dense<0.000000e+00> : vector<32x128xf32>
    %9 = tpu.matmul %7, %8, %cst_8 {dimension_numbers = #tpu.dot_dimension_numbers<[1], [0], [0], [1], [0, 0, 1, 1], [], []>} : vector<32x256xf32>, vector<256x128xf32>, vector<32x128xf32> -> vector<32x128xf32>
    %c0_9 = arith.constant 0 : index
    %c0_10 = arith.constant 0 : index
    %10 = vector.load %arg5[%c0_9, %c0_10] : memref<1x128xf32, #tpu.memory_space<vmem>>, vector<1x128xf32>
    %11 = vector.broadcast %10 : vector<1x128xf32> to vector<32x128xf32>
    %12 = arith.addf %9, %11 : vector<32x128xf32>
    %13 = math.tanh %12 : vector<32x128xf32>
    %14 = math.exp %13 : vector<32x128xf32>
    %15 = arith.mulf %0, %14 : vector<32x128xf32>
    %16 = arith.addf %15, %12 : vector<32x128xf32>
    %c0_11 = arith.constant 0 : index
    %c0_12 = arith.constant 0 : index
    %17 = vector.load %arg7[%c0_11, %c0_12] : memref<32x128xf32, #tpu.memory_space<vmem>>, vector<32x128xf32>
    tpu.vector_store %arg7[%c0_11, %c0_12], %16 {strides = array<i32>} : memref<32x128xf32, #tpu.memory_space<vmem>>, vector<32x128xf32>,
    %18 = arith.truncf %13 : vector<32x128xf32> to vector<32x128xbf16>
    %19 = arith.extf %18 : vector<32x128xbf16> to vector<32x128xf32>
    %20 = arith.subf %13, %19 : vector<32x128xf32>
    %c0_13 = arith.constant 0 : index
    %c0_14 = arith.constant 0 : index
    %21 = vector.load %arg6[%c0_13, %c0_14] : memref<128x8xf32, #tpu.memory_space<vmem>>, vector<128x8xf32>
    %cst_15 = arith.constant dense<0.000000e+00> : vector<32x8xf32>
    %22 = tpu.matmul %19, %21, %cst_15 {dimension_numbers = #tpu.dot_dimension_numbers<[1], [0], [0], [1], [0, 0, 1, 1], [], []>} : vector<32x128xf32>, vector<128x8xf32>, vector<32x8xf32> -> vector<32x8xf32>
    %c0_16 = arith.constant 0 : index
    %c0_17 = arith.constant 0 : index
    %23 = vector.load %arg6[%c0_16, %c0_17] : memref<128x8xf32, #tpu.memory_space<vmem>>, vector<128x8xf32>
    %cst_18 = arith.constant dense<0.000000e+00> : vector<32x8xf32>
    %24 = tpu.matmul %20, %23, %cst_18 {dimension_numbers = #tpu.dot_dimension_numbers<[1], [0], [0], [1], [0, 0, 1, 1], [], []>} : vector<32x128xf32>, vector<128x8xf32>, vector<32x8xf32> -> vector<32x8xf32>
    %25 = arith.addf %22, %24 : vector<32x8xf32>
    %c0_19 = arith.constant 0 : index
    %c0_20 = arith.constant 0 : index
    %26 = vector.load %arg8[%c0_19, %c0_20] : memref<32x8xf32, #tpu.memory_space<vmem>>, vector<32x8xf32>
    tpu.vector_store %arg8[%c0_19, %c0_20], %25 {strides = array<i32>} : memref<32x8xf32, #tpu.memory_space<vmem>>, vector<32x8xf32>,
    return
  }
  func.func @transform_0(%arg0: i32) -> (i32, i32) {
    %c0_i32 = arith.constant 0 : i32
    %c0_i32_0 = arith.constant 0 : i32
    return %arg0, %c0_i32 : i32, i32
  }
  func.func @transform_1(%arg0: i32) -> (i32, i32) {
    %c0_i32 = arith.constant 0 : i32
    %c0_i32_0 = arith.constant 0 : i32
    %c0_i32_1 = arith.constant 0 : i32
    return %c0_i32, %c0_i32_0 : i32, i32
  }
  func.func @transform_2(%arg0: i32) -> (i32, i32) {
    %c0_i32 = arith.constant 0 : i32
    %c0_i32_0 = arith.constant 0 : i32
    %c0_i32_1 = arith.constant 0 : i32
    return %c0_i32, %c0_i32_0 : i32, i32
  }
  func.func @transform_3(%arg0: i32) -> (i32, i32) {
    %c0_i32 = arith.constant 0 : i32
    %c0_i32_0 = arith.constant 0 : i32
    %c0_i32_1 = arith.constant 0 : i32
    return %c0_i32, %c0_i32_0 : i32, i32
  }
  func.func @transform_4(%arg0: i32) -> (i32, i32) {
    %c0_i32 = arith.constant 0 : i32
    %c0_i32_0 = arith.constant 0 : i32
    %c0_i32_1 = arith.constant 0 : i32
    return %c0_i32, %c0_i32_0 : i32, i32
  }
  func.func @transform_5(%arg0: i32) -> (i32, i32) {
    %c0_i32 = arith.constant 0 : i32
    %c0_i32_0 = arith.constant 0 : i32
    %c0_i32_1 = arith.constant 0 : i32
    return %c0_i32, %c0_i32_0 : i32, i32
  }
  func.func @transform_6(%arg0: i32) -> (i32, i32) {
    %c0_i32 = arith.constant 0 : i32
    %c0_i32_0 = arith.constant 0 : i32
    return %arg0, %c0_i32 : i32, i32
  }
  func.func @transform_7(%arg0: i32) -> (i32, i32) {
    %c0_i32 = arith.constant 0 : i32
    %c0_i32_0 = arith.constant 0 : i32
    return %arg0, %c0_i32 : i32, i32
  }
}

</mosaic_0001>

<bundles_post_ra>
// kernel: tile.13
= control target key start
LH: loop header
LB: loop body
LE: loop exit
PB: predicated region body
PF: predicated region fallthrough
CT: control target
= control target key end

     0   :  { %s22_s0 = inlined_call_operand.vmem [shape: f32[32], index: 0, kind: input, shape index: {}]   ;;  %s23_s1 = inlined_call_operand.vmem [shape: f32[8,32], index: 1, kind: output, shape index: {}]  }
   0x1   :  { %v4_v0 = vld [vmem:[%s22_s0] ss:$0 sm:$0xff] }
   0x2   :  { %5 = vst [vmem:[%s23_s1] sm:$0xff] %v4_v0 }

// kernel: tile.14
= control target key start
LH: loop header
LB: loop body
LE: loop exit
PB: predicated region body
PF: predicated region fallthrough
CT: control target
= control target key end

     0   :  { %s7_s6 = smov 3  ;;  %s14_s9 = smov 3  ;;  %vm4_vm0 = vcmask 261120   ;;  %vm11_vm1 = vcmask 1048320   ;;  %vm18_vm2 = vcmask 785920   ;;  %vm25_vm3 = vcmask 523520   ;;  %s76_s0 = inlined_call_operand.vmem [shape: f32[8,32], index: 0, kind: input, shape index: {}]   ;;  %s77_s1 = inlined_call_operand.vmem [shape: f32[1,256], index: 1, kind: output, shape index: {}]  }
   0x1   :  { %v38_v0 = vld [vmem:[%s76_s0 + $0x3] ss:$4 sm:%s7_s6]   ;;  %s45_s10 = smov 96   ;;  %s21_s11 = smov 3  ;;  %v39_v1 = vld [vmem:[%s76_s0 + $0x2] ss:$4 sm:%s14_s9]  }
   0x2   :  { %9 = vrot.lane.b32.xlu0 %v38_v0, %s45_s10  ;;  %v40_v2 = vld [vmem:[%s76_s0 + $0x1] ss:$4 sm:%s21_s11]   ;;  %s2_s16 = smov 3  ;;  %s46_s17 = smov 32  }
   0x3   :  { %23 = vrot.lane.b32.xlu1 %v40_v2, %s46_s17  ;;  %v3_v3 = vld [vmem:[%s76_s0] ss:$4 sm:%s2_s16]   ;;  %s47_s0 = smov 64  }
   0x4   :  { %5 = vst.msk [vmem:[#allocation0] ss:$8 sm:$0x3] %vm4_vm0, %v3_v3  }
   0x6   :  { %16 = vrot.lane.b32.xlu0 %v39_v1, %s47_s0 }
  0x74   :  { %v10_v4 = vpop.permute.xlu0 %9  }
  0x75   :  { %12 = vst.msk [vmem:[#allocation0] ss:$8 sm:$0x3] %vm11_vm1, %v10_v4   ;;  %v24_v5 = vpop.permute.xlu1 %23  }
  0x78   :  { %v17_v6 = vpop.permute.xlu0 %16  }
  0x79   :  { %19 = vst.msk [vmem:[#allocation0] ss:$8 sm:$0x3] %vm18_vm2, %v17_v6  }
  0x7a   :  { %26 = vst.msk [vmem:[#allocation0] ss:$8 sm:$0x3] %vm25_vm3, %v24_v5  }
  0x81   :  { %v30_v7 = vld [vmem:[#allocation0] sm:$0x1]  ;;  %v34_v8 = vld [vmem:[#allocation0 + $0x8] sm:$0x1] }
  0x82   :  { %32 = vst [vmem:[%s77_s1] sm:$0x1] %v30_v7  ;;  %41 = vst [vmem:[%s77_s1 + $0x1] sm:$0x1] %v34_v8 }

// kernel: tile.18
= control target key start
LH: loop header
LB: loop body
LE: loop exit
PB: predicated region body
PF: predicated region fallthrough
CT: control target
= control target key end

     0   :  { %s22_s0 = inlined_call_operand.vmem [shape: f32[16], index: 0, kind: input, shape index: {}]   ;;  %s23_s1 = inlined_call_operand.vmem [shape: f32[8,16], index: 1, kind: output, shape index: {}]  }
   0x1   :  { %v4_v0 = vld [vmem:[%s22_s0] ss:$0 sm:$0xff] }
   0x2   :  { %5 = vst [vmem:[%s23_s1] sm:$0xff] %v4_v0 }

// kernel: tile.19
= control target key start
LH: loop header
LB: loop body
LE: loop exit
PB: predicated region body
PF: predicated region fallthrough
CT: control target
= control target key end

     0   :  { %s67_s10 = smov 112   ;;  %s68_s11 = smov 80   ;;  %vm3_vm0 = vcmask 130048   ;;  %vm9_vm1 = vcmask 1048448   ;;  %vm15_vm2 = vcmask 917248   ;;  %vm21_vm3 = vcmask 786048   ;;  %s111_s0 = inlined_call_operand.vmem [shape: f32[8,16], index: 0, kind: input, shape index: {}]   ;;  %s112_s1 = inlined_call_operand.vmem [shape: f32[1,128], index: 1, kind: output, shape index: {}]  }
   0x1   :  { %v53_v0 = vld [vmem:[%s111_s0 + $0x7] sm:$0x1]   ;;  %v55_v1 = vld [vmem:[%s111_s0 + $0x5] sm:$0x1]   ;;  %v54_v2 = vld [vmem:[%s111_s0 + $0x6] sm:$0x1]  }
   0x2   :  { %7 = vrot.lane.b32.xlu0 %v53_v0, %s67_s10  ;;  %19 = vrot.lane.b32.xlu1 %v55_v1, %s68_s11  ;;  %v56_v3 = vld [vmem:[%s111_s0 + $0x4] sm:$0x1]   ;;  %v2_v4 = vld [vmem:[%s111_s0] sm:$0x1]   ;;  %s69_s18 = smov 96   ;;  %s70_s19 = smov 64  }
   0x3   :  { %4 = vst.msk [vmem:[#allocation0] sm:$0x1] %vm3_vm0, %v2_v4   ;;  %v57_v5 = vld [vmem:[%s111_s0 + $0x3] sm:$0x1]   ;;  %v58_v6 = vld [vmem:[%s111_s0 + $0x2] sm:$0x1]  }
   0x4   :  { %s71_s24 = smov 48   ;;  %s72_s25 = smov 32   ;;  %v59_v7 = vld [vmem:[%s111_s0 + $0x1] sm:$0x1]   ;;  %vm27_vm4 = vcmask 654848   ;;  %vm33_vm5 = vcmask 523648  }
   0x5   :  { %s73_s0 = smov 16   ;;  %vm39_vm6 = vcmask 392448   ;;  %vm45_vm7 = vcmask 261248  }
   0x6   :  { %13 = vrot.lane.b32.xlu0 %v54_v2, %s69_s18  ;;  %25 = vrot.lane.b32.xlu1 %v56_v3, %s70_s19 }
   0xa   :  { %31 = vrot.lane.b32.xlu0 %v57_v5, %s71_s24  ;;  %37 = vrot.lane.b32.xlu1 %v58_v6, %s72_s25 }
   0xe   :  { %43 = vrot.lane.b32.xlu0 %v59_v7, %s73_s0 }
  0x74   :  { %v8_v8 = vpop.permute.xlu0 %7   ;;  %v20_v9 = vpop.permute.xlu1 %19  }
  0x75   :  { %10 = vst.msk [vmem:[#allocation0] sm:$0x1] %vm9_vm1, %v8_v8  }
  0x78   :  { %v14_v10 = vpop.permute.xlu0 %13   ;;  %v26_v11 = vpop.permute.xlu1 %25  }
  0x79   :  { %16 = vst.msk [vmem:[#allocation0] sm:$0x1] %vm15_vm2, %v14_v10  }
  0x7a   :  { %22 = vst.msk [vmem:[#allocation0] sm:$0x1] %vm21_vm3, %v20_v9  }
  0x7b   :  { %28 = vst.msk [vmem:[#allocation0] sm:$0x1] %vm27_vm4, %v26_v11  }
  0x7c   :  { %v32_v12 = vpop.permute.xlu0 %31   ;;  %v38_v13 = vpop.permute.xlu1 %37  }
  0x7d   :  { %34 = vst.msk [vmem:[#allocation0] sm:$0x1] %vm33_vm5, %v32_v12  }
  0x7e   :  { %40 = vst.msk [vmem:[#allocation0] sm:$0x1] %vm39_vm6, %v38_v13  }
  0x80   :  { %v44_v14 = vpop.permute.xlu0 %43  }
  0x81   :  { %46 = vst.msk [vmem:[#allocation0] sm:$0x1] %vm45_vm7, %v44_v14  }
  0x88   :  { %v50_v15 = vld [vmem:[#allocation0] sm:$0x1] }
  0x89   :  { %52 = vst [vmem:[%s112_s1] sm:$0x1] %v50_v15 }

// kernel: autoregressive_flow_forward.1
= control target key start
LH: loop header
LB: loop body
LE: loop exit
PB: predicated region body
PF: predicated region fallthrough
CT: control target
= control target key end

     0   :  { %s1260_s24 = smov 0   ;;  %s1559_s0 = inlined_call_operand.vmem [shape: f32[64,128], index: 0, kind: input, shape index: {}]   ;;  %s1560_s1 = inlined_call_operand.vmem [shape: f32[128,256], index: 1, kind: input, shape index: {}]   ;;  %s1561_s2 = inlined_call_operand.vmem [shape: f32[1,256], index: 2, kind: input, shape index: {}]   ;;  %s1562_s3 = inlined_call_operand.vmem [shape: f32[256,128], index: 3, kind: input, shape index: {}]   ;;  %s1563_s4 = inlined_call_operand.vmem [shape: f32[1,128], index: 4, kind: input, shape index: {}]   ;;  %s1564_s5 = inlined_call_operand.vmem [shape: f32[128,8], index: 5, kind: input, shape index: {}]   ;;  %s1565_s6 = inlined_call_operand.vmem [shape: f32[64,128], index: 6, kind: output, shape index: {0}]   ;;  %s1566_s7 = inlined_call_operand.vmem [shape: f32[64,8], index: 7, kind: output, shape index: {1}]  }
   0x1 LB: > { %s880_s25 = sadd.s32 4294967295, %s1217_s24   ;;  %p884_p0 = scmp.ge.s32.totalorder %s1217_s24, 1  ;;  %s1217_s24 = sphi %s1260_s24, %s18_s24  }
   0x2   : > { %p241_p1 = scmp.lt.s32.totalorder %s1217_s24, 3 }
   0x4   : > { %p242_p2 = pnand %p884_p0, %p241_p1 }
   0x5   : > { %v301_v0 = vld [vmem:[%s1560_s1 + $0x8] sm:$0xff] (!%p242_p2)  ;;  %v303_v1 = vld [vmem:[%s1560_s1 + $0x18] sm:$0xff] (!%p242_p2)  ;;  %v300_v2 = vld [vmem:[%s1560_s1] sm:$0xff] (!%p242_p2)  ;;  %v1219_v7 = vmov (!%p242_p2), 0.0   ;;  %s1364_s23 = sshll.u32 (!%p242_p2), %s880_s25, 2  ;;  %vm785_vm0 = vcmask (!%p242_p2), 64512  }
   0x6   : > { %245 = sbr.rel (%p242_p2) target bundleno = 721 (0x2d1), region = 44  ;;  %v1054_v3 = vpack.c.bf16 (!%p242_p2), %v303_v1, %v301_v0  ;;  %v302_v4 = vld [vmem:[%s1560_s1 + $0x10] sm:$0xff] (!%p242_p2)  ;;  %v305_v5 = vld [vmem:[%s1560_s1 + $0x28] sm:$0xff] (!%p242_p2)  ;;  %v307_v6 = vld [vmem:[%s1560_s1 + $0x38] sm:$0xff] (!%p242_p2)  ;;  %408 = vmatprep.mubr.f32.mxu0 (!%p242_p2), %v1219_v7  ;;  %p279_p3 = scmp.lt.s32.totalorder (!%p242_p2), %s1364_s23, 7 }
   0x7   : > { %v1056_v8 = vpack.c.bf16 (!%p242_p2), %v302_v4, %v300_v2  ;;  %v1058_v9 = vpack.c.bf16 (!%p242_p2), %v307_v6, %v305_v5  ;;  %v304_v10 = vld [vmem:[%s1560_s1 + $0x20] sm:$0xff] (!%p242_p2)  ;;  %v306_v11 = vld [vmem:[%s1560_s1 + $0x30] sm:$0xff] (!%p242_p2)  ;;  %v309_v12 = vld [vmem:[%s1560_s1 + $0x48] sm:$0xff] (!%p242_p2) }
   0x8   : > { %1055 = vmatprep.subr.bf16.mxu0 (!%p242_p2), %v1054_v3  ;;  %v311_v13 = vld [vmem:[%s1560_s1 + $0x58] sm:$0xff] (!%p242_p2)  ;;  %v1060_v14 = vpack.c.bf16 (!%p242_p2), %v306_v11, %v304_v10  ;;  %v308_v16 = vld [vmem:[%s1560_s1 + $0x40] sm:$0xff] (!%p242_p2)  ;;  %v310_v17 = vld [vmem:[%s1560_s1 + $0x50] sm:$0xff] (!%p242_p2) }
   0x9   : > { %1057 = vmatpush1.bf16.msra.mxu0 (!%p242_p2), %v1056_v8  ;;  %v1062_v15 = vpack.c.bf16 (!%p242_p2), %v311_v13, %v309_v12  ;;  %v313_v18 = vld [vmem:[%s1560_s1 + $0x68] sm:$0xff] (!%p242_p2)  ;;  %v315_v19 = vld [vmem:[%s1560_s1 + $0x78] sm:$0xff] (!%p242_p2)  ;;  %v1064_v20 = vpack.c.bf16 (!%p242_p2), %v310_v17, %v308_v16  ;;  %v312_v22 = vld [vmem:[%s1560_s1 + $0x60] sm:$0xff] (!%p242_p2) }
   0xa   : > { %1059 = vmatprep.subr.bf16.mxu0 (!%p242_p2), %v1058_v9  ;;  %v1066_v21 = vpack.c.bf16 (!%p242_p2), %v315_v19, %v313_v18  ;;  %v314_v23 = vld [vmem:[%s1560_s1 + $0x70] sm:$0xff] (!%p242_p2)  ;;  %v317_v24 = vld [vmem:[%s1560_s1 + $0x88] sm:$0xff] (!%p242_p2)  ;;  %v319_v25 = vld [vmem:[%s1560_s1 + $0x98] sm:$0xff] (!%p242_p2) }
   0xb   : > { %v316_v26 = vld [vmem:[%s1560_s1 + $0x80] sm:$0xff] (!%p242_p2)  ;;  %v318_v27 = vld [vmem:[%s1560_s1 + $0x90] sm:$0xff] (!%p242_p2)  ;;  %v1068_v28 = vpack.c.bf16 (!%p242_p2), %v314_v23, %v312_v22  ;;  %v321_v29 = vld [vmem:[%s1560_s1 + $0xa8] sm:$0xff] (!%p242_p2)  ;;  %v1070_v34 = vpack.c.bf16 (!%p242_p2), %v319_v25, %v317_v24 }
   0xc   : > { %v323_v30 = vld [vmem:[%s1560_s1 + $0xb8] sm:$0xff] (!%p242_p2)  ;;  %v457_v31 = vld [vmem:[%s1562_s3 + $0x80] sm:$0xff] (!%p242_p2)  ;;  %v458_v32 = vld [vmem:[%s1562_s3 + $0x88] sm:$0xff] (!%p242_p2)  ;;  %v1072_v45 = vpack.c.bf16 (!%p242_p2), %v318_v27, %v316_v26 }
   0xd   : > { %1061 = vmatpush1.bf16.msra.mxu0 %v1060_v14  ;;  %v441_v33 = vld [vmem:[%s1562_s3] sm:$0xff]  ;;  %v1086_v35 = vpack.c.bf16 %v458_v32, %v457_v31  ;;  %v442_v36 = vld [vmem:[%s1562_s3 + $0x8] sm:$0xff]  ;;  %v459_v37 = vld [vmem:[%s1562_s3 + $0x90] sm:$0xff]  ;;  %v1074_v49 = vpack.c.bf16 %v323_v30, %v321_v29  ;;  %s1568_s23 = smov (!%p279_p3, %s1364_s23), 7 }
   0xe   : > { %1063 = vmatprep.subr.bf16.mxu0 %v1062_v15  ;;  %v460_v38 = vld [vmem:[%s1562_s3 + $0x98] sm:$0xff]  ;;  %v1088_v39 = vpack.c.bf16 %v442_v36, %v441_v33  ;;  %v443_v41 = vld [vmem:[%s1562_s3 + $0x10] sm:$0xff]  ;;  %v461_v43 = vld [vmem:[%s1562_s3 + $0xa0] sm:$0xff]  ;;  %s1433_s26 = sshll.u32 %s1568_s23, 3 }
   0xf   : > { %v1090_v40 = vpack.c.bf16 %v460_v38, %v459_v37  ;;  %v444_v42 = vld [vmem:[%s1562_s3 + $0x18] sm:$0xff]  ;;  %1087 = vmatprep.subr.bf16.mxu1 %v1086_v35  ;;  %v462_v44 = vld [vmem:[%s1562_s3 + $0xa8] sm:$0xff]  ;;  %v320_v46 = vld [vmem:[%s1560_s1 + $0xa0] sm:$0xff]  ;;  %s282_s9 = scalar_lea.vmem %s1559_s0, %s1433_s26  ;;  %s288_s29 = scalar_lea.vmem %s1565_s6, %s1433_s26 }
  0x10   : > { %v322_v47 = vld [vmem:[%s1560_s1 + $0xb0] sm:$0xff]  ;;  %1089 = vmatpush3.bf16.msra.mxu1 %v1088_v39  ;;  %v1092_v48 = vpack.c.bf16 %v444_v42, %v443_v41  ;;  %v325_v50 = vld [vmem:[%s1560_s1 + $0xc8] sm:$0xff]  ;;  %v1094_v51 = vpack.c.bf16 %v462_v44, %v461_v43  ;;  %v445_v52 = vld [vmem:[%s1562_s3 + $0x20] sm:$0xff]  ;;  %v334_v43 = vlaneseq  ;;  %s294_s25 = scalar_lea.vmem %s1566_s7, %s1433_s26 }
  0x11   : > { %1065 = vmatpush1.bf16.msra.mxu0 %v1064_v20  ;;  %1091 = vmatprep.subr.bf16.mxu1 %v1090_v40  ;;  %v446_v53 = vld [vmem:[%s1562_s3 + $0x28] sm:$0xff]  ;;  %v327_v54 = vld [vmem:[%s1560_s1 + $0xd8] sm:$0xff]  ;;  %v463_v55 = vld [vmem:[%s1562_s3 + $0xb0] sm:$0xff]  ;;  %v1076_v57 = vpack.c.bf16 %v322_v47, %v320_v46 }
  0x12   : > { %1067 = vmatprep.subr.bf16.mxu0 %v1066_v21  ;;  %v464_v56 = vld [vmem:[%s1562_s3 + $0xb8] sm:$0xff]  ;;  %v324_v58 = vld [vmem:[%s1560_s1 + $0xc0] sm:$0xff]  ;;  %v326_v59 = vld [vmem:[%s1560_s1 + $0xd0] sm:$0xff]  ;;  %v1096_v60 = vpack.c.bf16 %v446_v53, %v445_v52  ;;  %v1078_v61 = vpack.c.bf16 %v327_v54, %v325_v50  ;;  %v335_v44 = vshrl.u32 %v334_v43, 7 }
  0x13   : > { %v329_v62 = vld [vmem:[%s1560_s1 + $0xe8] sm:$0xff]  ;;  %v1098_v63 = vpack.c.bf16 %v464_v56, %v463_v55  ;;  %v447_v0 = vld [vmem:[%s1562_s3 + $0x30] sm:$0xff]  ;;  %v448_v1 = vld [vmem:[%s1562_s3 + $0x38] sm:$0xff]  ;;  %v1080_v5 = vpack.c.bf16 %v326_v59, %v324_v58 }
  0x14   : > { %1093 = vmatpush3.bf16.msra.mxu1 %v1092_v48  ;;  %v331_v2 = vld [vmem:[%s1560_s1 + $0xf8] sm:$0xff]  ;;  %v465_v3 = vld [vmem:[%s1562_s3 + $0xc0] sm:$0xff]  ;;  %v466_v4 = vld [vmem:[%s1562_s3 + $0xc8] sm:$0xff]  ;;  %v1100_v8 = vpack.c.bf16 %v448_v1, %v447_v0  ;;  %v340_v47 = vsub.s32 1, %v335_v44 }
  0x15   : > { %1069 = vmatpush1.bf16.msra.mxu0 %v1068_v28  ;;  %1095 = vmatprep.subr.bf16.mxu1 %v1094_v51  ;;  %v328_v6 = vld [vmem:[%s1560_s1 + $0xe0] sm:$0xff]  ;;  %v1082_v9 = vpack.c.bf16 %v331_v2, %v329_v62  ;;  %v330_v10 = vld [vmem:[%s1560_s1 + $0xf0] sm:$0xff]  ;;  %v1102_v11 = vpack.c.bf16 %v466_v4, %v465_v3  ;;  %v450_v13 = vld [vmem:[%s1562_s3 + $0x48] sm:$0xff] }
  0x16   : > { %1071 = vmatprep.subr.bf16.mxu0 %v1070_v34  ;;  %v449_v12 = vld [vmem:[%s1562_s3 + $0x40] sm:$0xff]  ;;  %v467_v14 = vld [vmem:[%s1562_s3 + $0xd0] sm:$0xff]  ;;  %v468_v15 = vld [vmem:[%s1562_s3 + $0xd8] sm:$0xff]  ;;  %v1084_v16 = vpack.c.bf16 %v330_v10, %v328_v6 }
  0x17   : > { %v1104_v17 = vpack.c.bf16 %v450_v13, %v449_v12  ;;  %v1106_v18 = vpack.c.bf16 %v468_v15, %v467_v14  ;;  %v451_v19 = vld [vmem:[%s1562_s3 + $0x50] sm:$0xff]  ;;  %v452_v20 = vld [vmem:[%s1562_s3 + $0x58] sm:$0xff]  ;;  %v469_v21 = vld [vmem:[%s1562_s3 + $0xe0] sm:$0xff] }
  0x18   : > { %1097 = vmatpush3.bf16.msra.mxu1 %v1096_v60  ;;  %v470_v22 = vld [vmem:[%s1562_s3 + $0xe8] sm:$0xff]  ;;  %v1457_v23 = vld [vmem:[%s282_s9] sm:$0xff]  ;;  %v1108_v24 = vpack.c.bf16 %v452_v20, %v451_v19  ;;  %v1465_v27 = vld [vmem:[%s282_s9 + $0x10] sm:$0xff] }
  0x19   : > { %1073 = vmatpush1.bf16.msra.mxu0 %v1072_v45  ;;  %1099 = vmatprep.subr.bf16.mxu1 %v1098_v63  ;;  %v1110_v25 = vpack.c.bf16 %v470_v22, %v469_v21  ;;  %v1461_v26 = vld [vmem:[%s282_s9 + $0x8] sm:$0xff]  ;;  %v1469_v28 = vld [vmem:[%s282_s9 + $0x18] sm:$0xff]  ;;  %v453_v29 = vld [vmem:[%s1562_s3 + $0x60] sm:$0xff]  ;;  %v336_v45 = vsub.s32 0, %v335_v44 }
  0x1a   : > { %1075 = vmatprep.subr.bf16.mxu0 %v1074_v49  ;;  %v454_v30 = vld [vmem:[%s1562_s3 + $0x68] sm:$0xff]  ;;  %v471_v32 = vld [vmem:[%s1562_s3 + $0xf0] sm:$0xff]  ;;  %v456_v35 = vld [vmem:[%s1562_s3 + $0x78] sm:$0xff] }
  0x1b   : > { %v1112_v31 = vpack.c.bf16 %v454_v30, %v453_v29  ;;  %v455_v34 = vld [vmem:[%s1562_s3 + $0x70] sm:$0xff]  ;;  %v599_v37 = vld [vmem:[%s1564_s5] sm:$0xff]  ;;  %v600_v38 = vld [vmem:[%s1564_s5 + $0x8] sm:$0xff] }
  0x1c   : > { %1101 = vmatpush3.bf16.msra.mxu1 %v1100_v8  ;;  %v1116_v36 = vpack.c.bf16 %v456_v35, %v455_v34  ;;  %v601_v39 = vld [vmem:[%s1564_s5 + $0x10] sm:$0xff]  ;;  %v1118_v40 = vpack.c.bf16 %v600_v38, %v599_v37  ;;  %v602_v41 = vld [vmem:[%s1564_s5 + $0x18] sm:$0xff]  ;;  %v332_v46 = vld [vmem:[%s1561_s2] sm:$0x3] }
  0x1d   : > { %1077 = vmatpush1.bf16.msra.mxu0 %v1076_v57  ;;  %1103 = vmatprep.subr.bf16.mxu1 %v1102_v11  ;;  %v1122_v42 = vpack.c.bf16 %v602_v41, %v601_v39  ;;  %v337_v48 = vrot.slane %v332_v46, %v336_v45  ;;  %v341_v49 = vrot.slane %v332_v46, %v340_v47  ;;  %v603_v11 = vld [vmem:[%s1564_s5 + $0x20] sm:$0xff]  ;;  %v604_v12 = vld [vmem:[%s1564_s5 + $0x28] sm:$0xff]  ;;  %v605_v14 = vld [vmem:[%s1564_s5 + $0x30] sm:$0xff] }
  0x1e   : > { %1079 = vmatprep.subr.bf16.mxu0 %v1078_v61  ;;  %v1126_v13 = vpack.c.bf16 %v604_v12, %v603_v11  ;;  %v606_v15 = vld [vmem:[%s1564_s5 + $0x38] sm:$0xff]  ;;  %v609_v20 = vld [vmem:[%s1564_s5 + $0x50] sm:$0xff] }
  0x1f   : > { %v610_v21 = vld [vmem:[%s1564_s5 + $0x58] sm:$0xff]  ;;  %v613_v30 = vld [vmem:[%s1564_s5 + $0x70] sm:$0xff] }
  0x20   : > { %1105 = vmatpush3.bf16.msra.mxu1 %v1104_v17  ;;  %v607_v17 = vld [vmem:[%s1564_s5 + $0x40] sm:$0xff]  ;;  %v1138_v22 = vpack.c.bf16 %v610_v21, %v609_v20 }
  0x21   : > { %1081 = vmatpush1.bf16.msra.mxu0 %v1080_v5  ;;  %1107 = vmatprep.subr.bf16.mxu1 %v1106_v18  ;;  %v608_v18 = vld [vmem:[%s1564_s5 + $0x48] sm:$0xff] }
  0x22   : > { %1083 = vmatprep.subr.bf16.mxu0 %v1082_v9  ;;  %v1134_v19 = vpack.c.bf16 %v608_v18, %v607_v17 }
  0x24   : > { %1109 = vmatpush3.bf16.msra.mxu1 %v1108_v24  ;;  %v611_v24 = vld [vmem:[%s1564_s5 + $0x60] sm:$0xff] }
  0x25   : > { %1085 = vmatpush1.bf16.msra.mxu0 %v1084_v16  ;;  %1111 = vmatprep.subr.bf16.mxu1 %v1110_v25  ;;  %v1130_v16 = vpack.c.bf16 %v606_v15, %v605_v14  ;;  %v612_v25 = vld [vmem:[%s1564_s5 + $0x68] sm:$0xff] }
  0x26   : > { %1151 = vmatprep.subr.bf16.mxu0 %v1118_v40  ;;  %v1142_v29 = vpack.c.bf16 %v612_v25, %v611_v24 }
  0x28   : > { %409 = vmatmul.mubr.f32.vlgmr.msra.gmra.mrb[0].mxu0 %v1457_v23  ;;  %1113 = vmatpush3.bf16.msra.mxu1 %v1112_v31  ;;  %v614_v31 = vld [vmem:[%s1564_s5 + $0x78] sm:$0xff] }
  0x29   : > { %414 = vmatprep.mubr.f32.mxu0 %v1219_v7  ;;  %1153 = vmatpush3.bf16.msra.mxu0 %v1118_v40 }
  0x2a   : > { %1155 = vmatprep.subr.bf16.mxu0 %v1122_v42 }
  0x2c   : > { %415 = vmatmul.mubr.f32.gmra.mrb[2].mxu0 %v1461_v26 }
  0x2d   : > { %420 = vmatprep.mubr.f32.mxu0 %v1219_v7  ;;  %1157 = vmatpush3.bf16.msra.mxu0 %v1122_v42 }
  0x2e   : > { %1159 = vmatprep.subr.bf16.mxu0 %v1126_v13 }
  0x30   : > { %421 = vmatmul.mubr.f32.gmra.mrb[4].mxu0 %v1465_v27 }
  0x31   : > { %426 = vmatprep.mubr.f32.mxu0 %v1219_v7  ;;  %v472_v7 = vld [vmem:[%s1562_s3 + $0xf8] sm:$0xff]  ;;  %1161 = vmatpush3.bf16.msra.mxu0 %v1126_v13 }
  0x32   : > { %v1114_v33 = vpack.c.bf16 %v472_v7, %v471_v32  ;;  %1163 = vmatprep.subr.bf16.mxu0 %v1130_v16  ;;  %v1146_v32 = vpack.c.bf16 %v614_v31, %v613_v30 }
  0x34   : > { %427 = vmatmul.mubr.f32.gmra.mrb[6].mxu0 %v1469_v28  ;;  %1115 = vmatprep.subr.bf16.mxu1 %v1114_v33  ;;  %v891_v33 = vld [vmem:[%s1563_s4] ss:$0 sm:$0xff] }
  0x35   : > { %1117 = vmatpush3.bf16.msra.mxu1 %v1116_v36  ;;  %1165 = vmatpush3.bf16.msra.mxu0 %v1130_v16 }
  0x36   : > { %1119 = vmatprep.subr.bf16.mxu1 %v1118_v40  ;;  %1167 = vmatprep.subr.bf16.mxu0 %v1134_v19 }
  0x39   : > { %1169 = vmatpush3.bf16.msra.mxu0 %v1134_v19 }
  0x3a   : > { %1171 = vmatprep.subr.bf16.mxu0 %v1138_v22 }
  0x3d   : > { %1173 = vmatpush3.bf16.msra.mxu0 %v1138_v22 }
  0x3e   : > { %1175 = vmatprep.subr.bf16.mxu0 %v1142_v29 }
  0x41   : > { %1177 = vmatpush3.bf16.msra.mxu0 %v1142_v29 }
  0x42   : > { %1179 = vmatprep.subr.bf16.mxu0 %v1146_v32 }
  0x45   : > { %1181 = vmatpush3.bf16.msra.mxu0 %v1146_v32 }
  0xfb   : > { %v410_v50 = vpop.f32.mrb[0].mxu0 }
  0xfc   : > { %v411_v51 = vadd.f32 %v410_v50, %v337_v48  ;;  %v412_v52 = vpop.f32.mrb[1].mxu0 }
  0xfd   : > { %v413_v53 = vadd.f32 %v412_v52, %v341_v49 }
  0xfe   : > { %v433_v56 = vmax.f32 %v411_v51, 0.0 }
  0xff   : > { %v416_v54 = vpop.f32.mrb[2].mxu0  ;;  %v434_v55 = vmax.f32 %v413_v53, 0.0 }
 0x100   : > { %v417_v57 = vadd.f32 %v416_v54, %v337_v48  ;;  %v418_v58 = vpop.f32.mrb[3].mxu0 }
 0x101   : > { %v419_v59 = vadd.f32 %v418_v58, %v341_v49  ;;  %544 = vmatprep.mubr.f32.mxu1 %v434_v55 }
 0x102   : > { %545 = vmatmul.mubr.f32.vlgmr.msra.gmra.mrb[0].mxu1 %v433_v56  ;;  %v435_v62 = vmax.f32 %v417_v57, 0.0 }
 0x103   : > { %v436_v60 = vmax.f32 %v419_v59, 0.0  ;;  %v422_v61 = vpop.f32.mrb[4].mxu0  ;;  %1121 = vmatpush3.bf16.msra.mxu1 %v1118_v40 }
 0x104   : > { %v423_v63 = vadd.f32 %v422_v61, %v337_v48  ;;  %v424_v0 = vpop.f32.mrb[5].mxu0  ;;  %1123 = vmatprep.subr.bf16.mxu1 %v1122_v42 }
 0x105   : > { %v425_v1 = vadd.f32 %v424_v0, %v341_v49  ;;  %549 = vmatprep.mubr.f32.mxu1 %v436_v60 }
 0x106   : > { %550 = vmatmul.mubr.f32.gmra.mrb[2].mxu1 %v435_v62  ;;  %v437_v4 = vmax.f32 %v423_v63, 0.0 }
 0x107   : > { %v438_v2 = vmax.f32 %v425_v1, 0.0  ;;  %v428_v3 = vpop.f32.mrb[6].mxu0  ;;  %1125 = vmatpush3.bf16.msra.mxu1 %v1122_v42 }
 0x108   : > { %v429_v5 = vadd.f32 %v428_v3, %v337_v48  ;;  %v430_v6 = vpop.f32.mrb[7].mxu0  ;;  %1127 = vmatprep.subr.bf16.mxu1 %v1126_v13 }
 0x109   : > { %v431_v8 = vadd.f32 %v430_v6, %v341_v49  ;;  %554 = vmatprep.mubr.f32.mxu1 %v438_v2 }
 0x10a   : > { %555 = vmatmul.mubr.f32.gmra.mrb[4].mxu1 %v437_v4  ;;  %v439_v10 = vmax.f32 %v429_v5, 0.0 }
 0x10b   : > { %v440_v9 = vmax.f32 %v431_v8, 0.0  ;;  %1129 = vmatpush3.bf16.msra.mxu1 %v1126_v13 }
 0x10c   : > { %1131 = vmatprep.subr.bf16.mxu1 %v1130_v16 }
 0x10d   : > { %559 = vmatprep.mubr.f32.mxu1 %v440_v9 }
 0x10e   : > { %560 = vmatmul.mubr.f32.gmra.mrb[6].mxu1 %v439_v10 }
 0x10f   : > { %1133 = vmatpush3.bf16.msra.mxu1 %v1130_v16 }
 0x110   : > { %1135 = vmatprep.subr.bf16.mxu1 %v1134_v19 }
 0x113   : > { %1137 = vmatpush3.bf16.msra.mxu1 %v1134_v19 }
 0x114   : > { %1139 = vmatprep.subr.bf16.mxu1 %v1138_v22 }
 0x117   : > { %1141 = vmatpush3.bf16.msra.mxu1 %v1138_v22 }
 0x118   : > { %1143 = vmatprep.subr.bf16.mxu1 %v1142_v29 }
 0x11b   : > { %1145 = vmatpush3.bf16.msra.mxu1 %v1142_v29 }
 0x11c   : > { %1147 = vmatprep.subr.bf16.mxu1 %v1146_v32 }
 0x11f   : > { %1149 = vmatpush3.bf16.msra.mxu1 %v1146_v32 }
 0x1d5   : > { %v926_v7 = vpop.f32.mrb[0].mxu1 }
 0x1d6   : > { %v927_v34 = vpop.f32.mrb[1].mxu1 }
 0x1d7   : > { %v928_v35 = vadd.f32 %v927_v34, %v926_v7 }
 0x1d9   : > { %v547_v36 = vadd.f32 %v928_v35, %v891_v33  ;;  %v929_v37 = vpop.f32.mrb[2].mxu1 }
 0x1da   : > { %v930_v38 = vpop.f32.mrb[3].mxu1 }
 0x1db   : > { %1195 = vtanh.f32 %v547_v36  ;;  %v931_v39 = vadd.f32 %v930_v38, %v929_v37 }
 0x1dd   : > { %v552_v40 = vadd.f32 %v931_v39, %v891_v33  ;;  %v932_v41 = vpop.f32.mrb[4].mxu1 }
 0x1de   : > { %v933_v42 = vpop.f32.mrb[5].mxu1 }
 0x1df   : > { %1197 = vtanh.f32 %v552_v40  ;;  %v934_v43 = vadd.f32 %v933_v42, %v932_v41 }
 0x1e1   : > { %v557_v44 = vadd.f32 %v934_v43, %v891_v33  ;;  %v935_v45 = vpop.f32.mrb[6].mxu1 }
 0x1e2   : > { %v936_v46 = vpop.f32.mrb[7].mxu1 }
 0x1e3   : > { %1199 = vtanh.f32 %v557_v44  ;;  %v937_v47 = vadd.f32 %v936_v46, %v935_v45 }
 0x1e5   : > { %v1196_v48 = vpop.eup %1195  ;;  %v562_v49 = vadd.f32 %v937_v47, %v891_v33 }
 0x1e6   : > { %v569_v50 = vmul.f32 1.442695, %v1196_v48 }
 0x1e7   : > { %1201 = vtanh.f32 %v562_v49 }
 0x1e8   : > { %1203 = vpow2.f32 %v569_v50 }
 0x1e9   : > { %v1198_v51 = vpop.eup %1197 }
 0x1ea   : > { %v571_v52 = vmul.f32 1.442695, %v1198_v51  ;;  %v589_v53 = vpack.c.bf16 %v1198_v51, %v1196_v48 }
 0x1ec   : > { %1205 = vpow2.f32 %v571_v52  ;;  %v591_v54 = vunpack.c.l.bf16 %v589_v53  ;;  %v592_v55 = vunpack.c.h.bf16 %v589_v53 }
 0x1ed   : > { %v1200_v56 = vpop.eup %1199 }
 0x1ee   : > { %v573_v57 = vmul.f32 1.442695, %v1200_v56  ;;  %v596_v58 = vsub.f32 %v1198_v51, %v592_v55  ;;  %1048 = vmatprep.mubr.f32.mxu0 %v591_v54  ;;  %v595_v59 = vsub.f32 %v1196_v48, %v591_v54 }
 0x1ef   : > { %1049 = vmatmul.mubr.f32.vlgmr.msra.gmra.mrb[8].mxu0 %v592_v55 }
 0x1f0   : > { %1207 = vpow2.f32 %v573_v57  ;;  %1010 = vmatprep.mubr.f32.mxu1 %v595_v59 }
 0x1f1   : > { %v1202_v60 = vpop.eup %1201  ;;  %1011 = vmatmul.mubr.f32.vlgmr.msra.gmra.mrb[8].mxu1 %v596_v58 }
 0x1f2   : > { %v1204_v61 = vpop.eup %1203  ;;  %v575_v62 = vmul.f32 1.442695, %v1202_v60  ;;  %v590_v63 = vpack.c.bf16 %v1202_v60, %v1200_v56 }
 0x1f3   : > { %v577_v0 = vmul.f32 %v1204_v61, %v1457_v23 }
 0x1f4   : > { %1209 = vpow2.f32 %v575_v62  ;;  %v593_v1 = vunpack.c.l.bf16 %v590_v63  ;;  %v594_v2 = vunpack.c.h.bf16 %v590_v63 }
 0x1f5   : > { %v581_v3 = vadd.f32 %v577_v0, %v547_v36 }
 0x1f6   : > { %v1206_v4 = vpop.eup %1205  ;;  %1051 = vmatprep.mubr.f32.mxu0 %v593_v1  ;;  %v597_v5 = vsub.f32 %v1200_v56, %v593_v1  ;;  %v598_v6 = vsub.f32 %v1202_v60, %v594_v2 }
 0x1f7   : > { %585 = vst [vmem:[%s288_s29] sm:$0xff] %v581_v3  ;;  %v578_v8 = vmul.f32 %v1206_v4, %v1461_v26  ;;  %1052 = vmatmul.mubr.f32.gmra.mrb[10].mxu0 %v594_v2 }
 0x1f8   : > { %1013 = vmatprep.mubr.f32.mxu1 %v597_v5 }
 0x1f9   : > { %v582_v9 = vadd.f32 %v578_v8, %v552_v40  ;;  %1014 = vmatmul.mubr.f32.gmra.mrb[10].mxu1 %v598_v6 }
 0x1fa   : > { %v1208_v23 = vpop.eup %1207 }
 0x1fb   : > { %586 = vst [vmem:[%s288_s29 + $0x8] sm:$0xff] %v582_v9  ;;  %v579_v10 = vmul.f32 %v1208_v23, %v1465_v27 }
 0x1fd   : > { %v583_v11 = vadd.f32 %v579_v10, %v557_v44 }
 0x1fe   : > { %v1210_v12 = vpop.eup %1209 }
 0x1ff   : > { %587 = vst [vmem:[%s288_s29 + $0x10] sm:$0xff] %v583_v11  ;;  %v580_v13 = vmul.f32 %v1210_v12, %v1469_v28 }
 0x201   : > { %v584_v14 = vadd.f32 %v580_v13, %v562_v49 }
 0x203   : > { %588 = vst [vmem:[%s288_s29 + $0x18] sm:$0xff] %v584_v14 }
 0x2c2   : > { %v1050_v15 = vpop.f32.mrb[8].mxu0 }
 0x2c3   : > { %v766_v16 = vpop.f32.mrb[9].mxu0 }
 0x2c4   : > { %v1012_v17 = vpop.f32.mrb[8].mxu1 }
 0x2c5   : > { %v772_v26 = vadd.f32 %v1050_v15, %v1012_v17  ;;  %v681_v18 = vpop.f32.mrb[9].mxu1 }
 0x2c6   : > { %v767_v19 = vadd.f32 %v766_v16, %v681_v18 }
 0x2c7   : > { %787 = vst.msk [vmem:[%s294_s25 + $0x8] sm:$0xff] %vm785_vm0, %v772_v26 }
 0x2c8   : > { %786 = vst.msk [vmem:[%s294_s25] sm:$0xff] %vm785_vm0, %v767_v19 }
 0x2ca   : > { %v1053_v27 = vpop.f32.mrb[10].mxu0 }
 0x2cb   : > { %v776_v20 = vpop.f32.mrb[11].mxu0 }
 0x2cc   : > { %v1015_v21 = vpop.f32.mrb[10].mxu1 }
 0x2cd   : > { %v782_v22 = vadd.f32 %v1053_v27, %v1015_v21  ;;  %v691_v28 = vpop.f32.mrb[11].mxu1 }
 0x2ce   : > { %v777_v24 = vadd.f32 %v776_v20, %v691_v28 }
 0x2cf   : > { %789 = vst.msk [vmem:[%s294_s25 + $0x18] sm:$0xff] %vm785_vm0, %v782_v22 }
 0x2d0   : > { %788 = vst.msk [vmem:[%s294_s25 + $0x10] sm:$0xff] %vm785_vm0, %v777_v24 }
 0x2d1 PF: > { %s18_s24 = sadd.s32 1, %s1217_s24  }
 0x2d2   : > { %p15_p4 = scmp.ge.s32.totalorder %s18_s24, 4  }
 0x2d4   :  { %17 = sbr.rel (!%p15_p4) target bundleno = 1 (0x1), region = 86 }

</bundles_post_ra>
